<compile_context>
chip_gen: v7x
topology: tpu7x:2x2x1
jax: 0.10.0
libtpu: 0.0.40
codegen_flags: <defaults>
</compile_context>

<pallas_src>
import functools

import jax
import jax.numpy as jnp
from jax.experimental import pallas as pl
from jax.experimental.pallas import tpu as pltpu

NEG_SLOPE = 0.01        # PyTorch nn.LeakyReLU default negative_slope
FEAT = 8                # padded feature width (sublane axis): 6 real + 1 zero + 1 ones-row
ONES_ROW = 7            # constant-1 row used to fold the bias into the matmul
N_LAYERS = 6
DEFAULT_BN = 512        # batch (lane) block size; ~100 KiB total VMEM, fine on v5e/v6e/v7x

# PyTorch layer sizes: encoder 6->4->2->1, decoder 1->2->4->6
LAYER_DIMS = [(6, 4), (4, 2), (2, 1), (1, 2), (2, 4), (4, 6)]


def _leaky_relu(x):
    return jnp.where(x > 0, x, NEG_SLOPE * x)


def autoencoder_kernel(x_ref, w_ref, enc_ref, dec_ref):
    """x_ref: (FEAT, bn) activations; w_ref: (N_LAYERS, FEAT, FEAT) augmented weights."""
    h = x_ref[...]                                        # (8, bn)
    for l in range(N_LAYERS):
        # W_aug[r, c] = W_l[c, r], W_aug[r, ONES_ROW] = b_l[r], W_aug[7,7] = 1
        # -> one matmul applies Linear + bias (bias rides on the constant-1 row).
        h = jnp.dot(w_ref[l], h, preferred_element_type=jnp.float32)
        if l < N_LAYERS - 1:
            h = _leaky_relu(h)            # LeakyReLU(1) == 1 keeps the carry row intact
        else:
            h = jnp.tanh(h)
        if l == 2:
            enc_ref[...] = h              # encoder output (row 0 holds the real value)
    dec_ref[...] = h


def init_params(key):
    """Deterministic params, PyTorch-style uniform(-1/sqrt(fan_in), 1/sqrt(fan_in))."""
    # TODO(synk): torch.manual_seed(1234) init values are not bit-reproducible in JAX;
    # we use an equivalent deterministic jax.random init instead.
    params = []
    for (fan_in, fan_out) in LAYER_DIMS:
        key, kw, kb = jax.random.split(key, 3)
        bound = 1.0 / jnp.sqrt(jnp.float32(fan_in))
        # stored as (fan_in, fan_out) so the reference forward is x @ W + b
        w = jax.random.uniform(kw, (fan_in, fan_out), jnp.float32, -bound, bound)
        b = jax.random.uniform(kb, (fan_out,), jnp.float32, -bound, bound)
        params.append((w, b))
    return params


def pack_params(params):
    """Pack all 6 (W, b) pairs into one (6, 8, 8) augmented-weight slab."""
    slab = jnp.zeros((N_LAYERS, FEAT, FEAT), jnp.float32)
    for l, (w, b) in enumerate(params):
        fan_in, fan_out = w.shape
        slab = slab.at[l, :fan_out, :fan_in].set(w.T)     # transposed weight
        slab = slab.at[l, :fan_out, ONES_ROW].set(b)      # bias column
        slab = slab.at[l, ONES_ROW, ONES_ROW].set(1.0)    # carry the ones row forward
    return slab


@functools.partial(jax.jit, static_argnames=("bn",))
def autoencoder_forward(x, w_slab, *, bn=DEFAULT_BN):
    """x: (B, 6) float32 -> (encoded (B, 1), decoded (B, 6))."""
    B = x.shape[0]
    n_blocks = pl.cdiv(B, bn)
    B_pad = n_blocks * bn

    # Transposed layout: features on sublanes, batch on lanes; constant-1 bias row.
    x_pad = jnp.zeros((FEAT, B_pad), jnp.float32)
    x_pad = x_pad.at[:6, :B].set(x.T)
    x_pad = x_pad.at[ONES_ROW, :].set(1.0)

    enc_pad, dec_pad = pl.pallas_call(
        autoencoder_kernel,
        out_shape=(
            jax.ShapeDtypeStruct((FEAT, B_pad), jnp.float32),
            jax.ShapeDtypeStruct((FEAT, B_pad), jnp.float32),
        ),
        grid=(n_blocks,),
        in_specs=[
            pl.BlockSpec((FEAT, bn), lambda i: (0, i)),
            pl.BlockSpec((N_LAYERS, FEAT, FEAT), lambda i: (0, 0, 0)),  # resident params
        ],
        out_specs=(
            pl.BlockSpec((FEAT, bn), lambda i: (0, i)),
            pl.BlockSpec((FEAT, bn), lambda i: (0, i)),
        ),
        compiler_params=pltpu.CompilerParams(
            dimension_semantics=("parallel",)),   # v7x: shard batch over both TCs
    )(x_pad, w_slab)

    encoded = enc_pad[:1, :B].T       # (B, 1)
    decoded = dec_pad[:6, :B].T       # (B, 6)
    return encoded, decoded


def reference_forward(x, params):
    """Pure-JAX reference of the PyTorch forward."""
    h = x
    for (w, b) in params[:3]:
        h = jnp.dot(h, w) + b
        h = jnp.where(h > 0, h, NEG_SLOPE * h)
    encoded = h
    for i, (w, b) in enumerate(params[3:]):
        h = jnp.dot(h, w) + b
        if i < 2:
            h = jnp.where(h > 0, h, NEG_SLOPE * h)
        else:
            h = jnp.tanh(h)
    return encoded, h


if __name__ == "__main__":
    key = jax.random.PRNGKey(0)
    pkey, xkey = jax.random.split(key)

    params = init_params(pkey)
    w_slab = pack_params(params)

    # small input consistent with the module: batch=2, features=6
    x = jax.random.normal(xkey, (2, 6), jnp.float32)

    encoded, decoded = autoencoder_forward(x, w_slab)
    jax.block_until_ready((encoded, decoded))

    # sanity check against pure-JAX reference
    enc_ref, dec_ref = reference_forward(x, params)
    assert encoded.shape == (2, 1) and decoded.shape == (2, 6)
    assert jnp.allclose(encoded, enc_ref, atol=1e-5, rtol=1e-5)
    assert jnp.allclose(decoded, dec_ref, atol=1e-5, rtol=1e-5)

    # also exercise a batch that spans multiple grid blocks (previously impossible)
    xb = jax.random.normal(jax.random.PRNGKey(42), (1030, 6), jnp.float32)
    enc_b, dec_b = autoencoder_forward(xb, w_slab)
    jax.block_until_ready((enc_b, dec_b))
    enc_b_ref, dec_b_ref = reference_forward(xb, params)
    assert enc_b.shape == (1030, 1) and dec_b.shape == (1030, 6)
    assert jnp.allclose(enc_b, enc_b_ref, atol=1e-4, rtol=1e-4)
    assert jnp.allclose(dec_b, dec_b_ref, atol=1e-4, rtol=1e-4)

    print("KERNEL_OK")
</pallas_src>

<mosaic_0001>
module attributes {stable_mosaic.version = 11 : i64} {
  func.func @autoencoder_kernel(%arg0: i32, %arg1: memref<8x512xf32, #tpu.memory_space<vmem>>, %arg2: memref<6x8x8xf32, #tpu.memory_space<vmem>>, %arg3: memref<8x512xf32, #tpu.memory_space<vmem>>, %arg4: memref<8x512xf32, #tpu.memory_space<vmem>>) attributes {dimension_semantics = [#tpu.dimension_semantics<parallel>], iteration_bounds = array<i64: 1>, scalar_prefetch = 0 : i64, scratch_operands = 0 : i64, tpu.core_type = #tpu.core_type<tc>, window_params = [{transform_indices = @transform_0, window_bounds = array<i64: 8, 512>}, {pipeline_mode = #tpu.pipeline_mode<synchronous>, transform_indices = @transform_1, window_bounds = array<i64: 6, 8, 8>}, {transform_indices = @transform_2, window_bounds = array<i64: 8, 512>}, {transform_indices = @transform_3, window_bounds = array<i64: 8, 512>}]} {
    %c0 = arith.constant 0 : index
    %c0_0 = arith.constant 0 : index
    %0 = vector.load %arg1[%c0, %c0_0] : memref<8x512xf32, #tpu.memory_space<vmem>>, vector<8x512xf32>
    %c0_1 = arith.constant 0 : index
    %c0_2 = arith.constant 0 : index
    %c0_3 = arith.constant 0 : index
    %1 = vector.load %arg2[%c0_1, %c0_2, %c0_3] : memref<6x8x8xf32, #tpu.memory_space<vmem>>, vector<1x8x8xf32>
    %2 = vector.shape_cast %1 : vector<1x8x8xf32> to vector<8x8xf32>
    %cst = arith.constant dense<0.000000e+00> : vector<8x512xf32>
    %3 = tpu.matmul %2, %0, %cst {dimension_numbers = #tpu.dot_dimension_numbers<[1], [0], [0], [1], [0, 0, 1, 1], [], []>} : vector<8x8xf32>, vector<8x512xf32>, vector<8x512xf32> -> vector<8x512xf32>
    %cst_4 = arith.constant 0.000000e+00 : f32
    %4 = vector.broadcast %cst_4 : f32 to vector<8x512xf32>
    %5 = arith.cmpf ogt, %3, %4 : vector<8x512xf32>
    %cst_5 = arith.constant 0.00999999977 : f32
    %6 = vector.broadcast %cst_5 : f32 to vector<8x512xf32>
    %7 = arith.mulf %6, %3 : vector<8x512xf32>
    %8 = arith.select %5, %3, %7 : vector<8x512xi1>, vector<8x512xf32>
    %c1 = arith.constant 1 : index
    %c0_6 = arith.constant 0 : index
    %c0_7 = arith.constant 0 : index
    %9 = vector.load %arg2[%c1, %c0_6, %c0_7] : memref<6x8x8xf32, #tpu.memory_space<vmem>>, vector<1x8x8xf32>
    %10 = vector.shape_cast %9 : vector<1x8x8xf32> to vector<8x8xf32>
    %cst_8 = arith.constant dense<0.000000e+00> : vector<8x512xf32>
    %11 = tpu.matmul %10, %8, %cst_8 {dimension_numbers = #tpu.dot_dimension_numbers<[1], [0], [0], [1], [0, 0, 1, 1], [], []>} : vector<8x8xf32>, vector<8x512xf32>, vector<8x512xf32> -> vector<8x512xf32>
    %cst_9 = arith.constant 0.000000e+00 : f32
    %12 = vector.broadcast %cst_9 : f32 to vector<8x512xf32>
    %13 = arith.cmpf ogt, %11, %12 : vector<8x512xf32>
    %cst_10 = arith.constant 0.00999999977 : f32
    %14 = vector.broadcast %cst_10 : f32 to vector<8x512xf32>
    %15 = arith.mulf %14, %11 : vector<8x512xf32>
    %16 = arith.select %13, %11, %15 : vector<8x512xi1>, vector<8x512xf32>
    %c2 = arith.constant 2 : index
    %c0_11 = arith.constant 0 : index
    %c0_12 = arith.constant 0 : index
    %17 = vector.load %arg2[%c2, %c0_11, %c0_12] : memref<6x8x8xf32, #tpu.memory_space<vmem>>, vector<1x8x8xf32>
    %18 = vector.shape_cast %17 : vector<1x8x8xf32> to vector<8x8xf32>
    %cst_13 = arith.constant dense<0.000000e+00> : vector<8x512xf32>
    %19 = tpu.matmul %18, %16, %cst_13 {dimension_numbers = #tpu.dot_dimension_numbers<[1], [0], [0], [1], [0, 0, 1, 1], [], []>} : vector<8x8xf32>, vector<8x512xf32>, vector<8x512xf32> -> vector<8x512xf32>
    %cst_14 = arith.constant 0.000000e+00 : f32
    %20 = vector.broadcast %cst_14 : f32 to vector<8x512xf32>
    %21 = arith.cmpf ogt, %19, %20 : vector<8x512xf32>
    %cst_15 = arith.constant 0.00999999977 : f32
    %22 = vector.broadcast %cst_15 : f32 to vector<8x512xf32>
    %23 = arith.mulf %22, %19 : vector<8x512xf32>
    %24 = arith.select %21, %19, %23 : vector<8x512xi1>, vector<8x512xf32>
    %c0_16 = arith.constant 0 : index
    %c0_17 = arith.constant 0 : index
    %25 = vector.load %arg3[%c0_16, %c0_17] : memref<8x512xf32, #tpu.memory_space<vmem>>, vector<8x512xf32>
    tpu.vector_store %arg3[%c0_16, %c0_17], %24 {strides = array<i32>} : memref<8x512xf32, #tpu.memory_space<vmem>>, vector<8x512xf32>,
    %c3 = arith.constant 3 : index
    %c0_18 = arith.constant 0 : index
    %c0_19 = arith.constant 0 : index
    %26 = vector.load %arg2[%c3, %c0_18, %c0_19] : memref<6x8x8xf32, #tpu.memory_space<vmem>>, vector<1x8x8xf32>
    %27 = vector.shape_cast %26 : vector<1x8x8xf32> to vector<8x8xf32>
    %cst_20 = arith.constant dense<0.000000e+00> : vector<8x512xf32>
    %28 = tpu.matmul %27, %24, %cst_20 {dimension_numbers = #tpu.dot_dimension_numbers<[1], [0], [0], [1], [0, 0, 1, 1], [], []>} : vector<8x8xf32>, vector<8x512xf32>, vector<8x512xf32> -> vector<8x512xf32>
    %cst_21 = arith.constant 0.000000e+00 : f32
    %29 = vector.broadcast %cst_21 : f32 to vector<8x512xf32>
    %30 = arith.cmpf ogt, %28, %29 : vector<8x512xf32>
    %cst_22 = arith.constant 0.00999999977 : f32
    %31 = vector.broadcast %cst_22 : f32 to vector<8x512xf32>
    %32 = arith.mulf %31, %28 : vector<8x512xf32>
    %33 = arith.select %30, %28, %32 : vector<8x512xi1>, vector<8x512xf32>
    %c4 = arith.constant 4 : index
    %c0_23 = arith.constant 0 : index
    %c0_24 = arith.constant 0 : index
    %34 = vector.load %arg2[%c4, %c0_23, %c0_24] : memref<6x8x8xf32, #tpu.memory_space<vmem>>, vector<1x8x8xf32>
    %35 = vector.shape_cast %34 : vector<1x8x8xf32> to vector<8x8xf32>
    %cst_25 = arith.constant dense<0.000000e+00> : vector<8x512xf32>
    %36 = tpu.matmul %35, %33, %cst_25 {dimension_numbers = #tpu.dot_dimension_numbers<[1], [0], [0], [1], [0, 0, 1, 1], [], []>} : vector<8x8xf32>, vector<8x512xf32>, vector<8x512xf32> -> vector<8x512xf32>
    %cst_26 = arith.constant 0.000000e+00 : f32
    %37 = vector.broadcast %cst_26 : f32 to vector<8x512xf32>
    %38 = arith.cmpf ogt, %36, %37 : vector<8x512xf32>
    %cst_27 = arith.constant 0.00999999977 : f32
    %39 = vector.broadcast %cst_27 : f32 to vector<8x512xf32>
    %40 = arith.mulf %39, %36 : vector<8x512xf32>
    %41 = arith.select %38, %36, %40 : vector<8x512xi1>, vector<8x512xf32>
    %c5 = arith.constant 5 : index
    %c0_28 = arith.constant 0 : index
    %c0_29 = arith.constant 0 : index
    %42 = vector.load %arg2[%c5, %c0_28, %c0_29] : memref<6x8x8xf32, #tpu.memory_space<vmem>>, vector<1x8x8xf32>
    %43 = vector.shape_cast %42 : vector<1x8x8xf32> to vector<8x8xf32>
    %cst_30 = arith.constant dense<0.000000e+00> : vector<8x512xf32>
    %44 = tpu.matmul %43, %41, %cst_30 {dimension_numbers = #tpu.dot_dimension_numbers<[1], [0], [0], [1], [0, 0, 1, 1], [], []>} : vector<8x8xf32>, vector<8x512xf32>, vector<8x512xf32> -> vector<8x512xf32>
    %45 = math.tanh %44 : vector<8x512xf32>
    %c0_31 = arith.constant 0 : index
    %c0_32 = arith.constant 0 : index
    %46 = vector.load %arg4[%c0_31, %c0_32] : memref<8x512xf32, #tpu.memory_space<vmem>>, vector<8x512xf32>
    tpu.vector_store %arg4[%c0_31, %c0_32], %45 {strides = array<i32>} : memref<8x512xf32, #tpu.memory_space<vmem>>, vector<8x512xf32>,
    return
  }
  func.func @transform_0(%arg0: i32) -> (i32, i32) {
    %c0_i32 = arith.constant 0 : i32
    %c0_i32_0 = arith.constant 0 : i32
    return %c0_i32, %arg0 : i32, i32
  }
  func.func @transform_1(%arg0: i32) -> (i32, i32, i32) {
    %c0_i32 = arith.constant 0 : i32
    %c0_i32_0 = arith.constant 0 : i32
    %c0_i32_1 = arith.constant 0 : i32
    %c0_i32_2 = arith.constant 0 : i32
    return %c0_i32, %c0_i32_0, %c0_i32_1 : i32, i32, i32
  }
  func.func @transform_2(%arg0: i32) -> (i32, i32) {
    %c0_i32 = arith.constant 0 : i32
    %c0_i32_0 = arith.constant 0 : i32
    return %c0_i32, %arg0 : i32, i32
  }
  func.func @transform_3(%arg0: i32) -> (i32, i32) {
    %c0_i32 = arith.constant 0 : i32
    %c0_i32_0 = arith.constant 0 : i32
    return %c0_i32, %arg0 : i32, i32
  }
}

</mosaic_0001>

<bundles_post_ra>
// kernel: autoencoder_forward.1
= control target key start
LH: loop header
LB: loop body
LE: loop exit
PB: predicated region body
PF: predicated region fallthrough
CT: control target
= control target key end

     0   :  { %v1005_v3 = vmov 0.0   ;;  %vm18_vm0 = vcmask 64512   ;;  %s1104_s0 = inlined_call_operand.vmem [shape: f32[8,512], index: 0, kind: input, shape index: {}]   ;;  %s1105_s1 = inlined_call_operand.vmem [shape: f32[6,8,8], index: 1, kind: input, shape index: {}]   ;;  %s1106_s2 = inlined_call_operand.vmem [shape: f32[8,512], index: 2, kind: output, shape index: {0}]   ;;  %s1107_s3 = inlined_call_operand.vmem [shape: f32[8,512], index: 3, kind: output, shape index: {1}]  }
   0x1   :  { %v14_v0 = vld [vmem:[%s1104_s0 + $0x8] sm:$0xff]  ;;  %v16_v1 = vld [vmem:[%s1104_s0 + $0x18] sm:$0xff]  ;;  %v13_v2 = vld [vmem:[%s1104_s0] sm:$0xff]  ;;  %86 = vmatprep.mubr.f32.mxu0 %v1005_v3  ;;  %157 = vmatprep.mubr.f32.mxu1 %v1005_v3 }
   0x2   :  { %22 = vmatprep.subr.mxu0 %v14_v0  ;;  %93 = vmatprep.subr.mxu1 %v16_v1  ;;  %v15_v4 = vld [vmem:[%s1104_s0 + $0x10] sm:$0xff]  ;;  %v17_v5 = vld [vmem:[%s1105_s1] sm:$0xff]  ;;  %v981_v16 = vld [vmem:[%s1105_s1 + $0x8] sm:$0xff] }
   0x3   :  { %23 = vmatpush1.msra.mxu0 %v13_v2  ;;  %94 = vmatpush1.msra.mxu1 %v15_v4  ;;  %v984_v29 = vld [vmem:[%s1105_s1 + $0x10] sm:$0xff]  ;;  %v987_v44 = vld [vmem:[%s1105_s1 + $0x18] sm:$0xff]  ;;  %v990_v55 = vld [vmem:[%s1105_s1 + $0x20] sm:$0xff] }
   0x4   :  { %979 = vmatmul.mubr.msk.f32.vlgmr.msra.gmra.mrb[0].mxu0 %vm18_vm0, %v17_v5  ;;  %980 = vmatmul.mubr.msk.f32.vlgmr.msra.gmra.mrb[0].mxu1 %vm18_vm0, %v17_v5  ;;  %v993_v5 = vld [vmem:[%s1105_s1 + $0x28] sm:$0xff] }
   0x5   :  { %245 = vmatprep.mubr.f32.mxu0 %v1005_v3  ;;  %316 = vmatprep.mubr.f32.mxu1 %v1005_v3 }
  0xd7   :  { %v88_v6 = vpop.f32.mrb[0].mxu0  ;;  %v159_v7 = vpop.f32.mrb[0].mxu1 }
  0xd8   :  { %v168_v8 = vmul.f32 0.01, %v88_v6  ;;  %vm164_vm1 = vcmp.gt.f32.partialorder %v88_v6, 0.0  ;;  %vm166_vm2 = vcmp.gt.f32.partialorder %v159_v7, 0.0  ;;  %v170_v9 = vmul.f32 0.01, %v159_v7 }
  0xd9   :  { %v90_v10 = vpop.f32.mrb[1].mxu0  ;;  %v161_v11 = vpop.f32.mrb[1].mxu1 }
  0xda   :  { %vm165_vm3 = vcmp.gt.f32.partialorder %v90_v10, 0.0  ;;  %v169_v12 = vmul.f32 0.01, %v90_v10  ;;  %vm167_vm4 = vcmp.gt.f32.partialorder %v161_v11, 0.0  ;;  %v171_v13 = vmul.f32 0.01, %v161_v11 }
  0xdb   :  { %v172_v17 = vsel %vm164_vm1, %v88_v6, %v168_v8  ;;  %v174_v18 = vsel %vm166_vm2, %v159_v7, %v170_v9 }
  0xdc   :  { %v173_v14 = vsel %vm165_vm3, %v90_v10, %v169_v12  ;;  %v175_v15 = vsel %vm167_vm4, %v161_v11, %v171_v13 }
  0xdd   :  { %181 = vmatprep.subr.mxu0 %v173_v14  ;;  %252 = vmatprep.subr.mxu1 %v175_v15 }
  0xde   :  { %182 = vmatpush1.msra.mxu0 %v172_v17  ;;  %253 = vmatpush1.msra.mxu1 %v174_v18 }
  0xdf   :  { %982 = vmatmul.mubr.msk.f32.vlgmr.msra.gmra.mrb[2].mxu0 %vm18_vm0, %v981_v16  ;;  %983 = vmatmul.mubr.msk.f32.vlgmr.msra.gmra.mrb[2].mxu1 %vm18_vm0, %v981_v16 }
  0xe0   :  { %404 = vmatprep.mubr.f32.mxu0 %v1005_v3  ;;  %475 = vmatprep.mubr.f32.mxu1 %v1005_v3 }
 0x1b2   :  { %v247_v19 = vpop.f32.mrb[2].mxu0  ;;  %v318_v20 = vpop.f32.mrb[2].mxu1 }
 0x1b3   :  { %v327_v21 = vmul.f32 0.01, %v247_v19  ;;  %vm323_vm5 = vcmp.gt.f32.partialorder %v247_v19, 0.0  ;;  %vm325_vm6 = vcmp.gt.f32.partialorder %v318_v20, 0.0  ;;  %v329_v22 = vmul.f32 0.01, %v318_v20 }
 0x1b4   :  { %v249_v23 = vpop.f32.mrb[3].mxu0  ;;  %v320_v24 = vpop.f32.mrb[3].mxu1 }
 0x1b5   :  { %vm324_vm7 = vcmp.gt.f32.partialorder %v249_v23, 0.0  ;;  %v328_v25 = vmul.f32 0.01, %v249_v23  ;;  %vm326_vm8 = vcmp.gt.f32.partialorder %v320_v24, 0.0  ;;  %v330_v26 = vmul.f32 0.01, %v320_v24 }
 0x1b6   :  { %v331_v30 = vsel %vm323_vm5, %v247_v19, %v327_v21  ;;  %v333_v31 = vsel %vm325_vm6, %v318_v20, %v329_v22 }
 0x1b7   :  { %v332_v27 = vsel %vm324_vm7, %v249_v23, %v328_v25  ;;  %v334_v28 = vsel %vm326_vm8, %v320_v24, %v330_v26 }
 0x1b8   :  { %340 = vmatprep.subr.mxu0 %v332_v27  ;;  %411 = vmatprep.subr.mxu1 %v334_v28 }
 0x1b9   :  { %341 = vmatpush1.msra.mxu0 %v331_v30  ;;  %412 = vmatpush1.msra.mxu1 %v333_v31 }
 0x1ba   :  { %985 = vmatmul.mubr.msk.f32.vlgmr.msra.gmra.mrb[4].mxu0 %vm18_vm0, %v984_v29  ;;  %986 = vmatmul.mubr.msk.f32.vlgmr.msra.gmra.mrb[4].mxu1 %vm18_vm0, %v984_v29 }
 0x1bb   :  { %567 = vmatprep.mubr.f32.mxu0 %v1005_v3  ;;  %638 = vmatprep.mubr.f32.mxu1 %v1005_v3 }
 0x28d   :  { %v406_v32 = vpop.f32.mrb[4].mxu0  ;;  %v477_v33 = vpop.f32.mrb[4].mxu1 }
 0x28e   :  { %vm482_vm9 = vcmp.gt.f32.partialorder %v406_v32, 0.0  ;;  %v486_v34 = vmul.f32 0.01, %v406_v32  ;;  %vm484_vm10 = vcmp.gt.f32.partialorder %v477_v33, 0.0  ;;  %v488_v35 = vmul.f32 0.01, %v477_v33 }
 0x28f   :  { %v408_v36 = vpop.f32.mrb[5].mxu0  ;;  %v479_v37 = vpop.f32.mrb[5].mxu1 }
 0x290   :  { %vm483_vm11 = vcmp.gt.f32.partialorder %v408_v36, 0.0  ;;  %v487_v38 = vmul.f32 0.01, %v408_v36  ;;  %vm485_vm12 = vcmp.gt.f32.partialorder %v479_v37, 0.0  ;;  %v489_v39 = vmul.f32 0.01, %v479_v37 }
 0x291   :  { %v490_v40 = vsel %vm482_vm9, %v406_v32, %v486_v34  ;;  %v492_v41 = vsel %vm484_vm10, %v477_v33, %v488_v35 }
 0x292   :  { %v491_v42 = vsel %vm483_vm11, %v408_v36, %v487_v38  ;;  %v493_v43 = vsel %vm485_vm12, %v479_v37, %v489_v39  ;;  %494 = vst [vmem:[%s1106_s2] sm:$0xff] %v490_v40  ;;  %496 = vst [vmem:[%s1106_s2 + $0x10] sm:$0xff] %v492_v41 }
 0x293   :  { %495 = vst [vmem:[%s1106_s2 + $0x8] sm:$0xff] %v491_v42  ;;  %503 = vmatprep.subr.mxu0 %v491_v42  ;;  %497 = vst [vmem:[%s1106_s2 + $0x18] sm:$0xff] %v493_v43  ;;  %574 = vmatprep.subr.mxu1 %v493_v43 }
 0x294   :  { %504 = vmatpush1.msra.mxu0 %v490_v40  ;;  %575 = vmatpush1.msra.mxu1 %v492_v41 }
 0x295   :  { %988 = vmatmul.mubr.msk.f32.vlgmr.msra.gmra.mrb[6].mxu0 %vm18_vm0, %v987_v44  ;;  %989 = vmatmul.mubr.msk.f32.vlgmr.msra.gmra.mrb[6].mxu1 %vm18_vm0, %v987_v44 }
 0x296   :  { %726 = vmatprep.mubr.f32.mxu0 %v1005_v3  ;;  %797 = vmatprep.mubr.f32.mxu1 %v1005_v3 }
 0x368   :  { %v569_v45 = vpop.f32.mrb[6].mxu0  ;;  %v640_v46 = vpop.f32.mrb[6].mxu1 }
 0x369   :  { %v649_v47 = vmul.f32 0.01, %v569_v45  ;;  %vm645_vm13 = vcmp.gt.f32.partialorder %v569_v45, 0.0  ;;  %vm647_vm14 = vcmp.gt.f32.partialorder %v640_v46, 0.0  ;;  %v651_v48 = vmul.f32 0.01, %v640_v46 }
 0x36a   :  { %v571_v49 = vpop.f32.mrb[7].mxu0  ;;  %v642_v50 = vpop.f32.mrb[7].mxu1 }
 0x36b   :  { %vm646_vm15 = vcmp.gt.f32.partialorder %v571_v49, 0.0  ;;  %v650_v51 = vmul.f32 0.01, %v571_v49  ;;  %vm648_vm1 = vcmp.gt.f32.partialorder %v642_v50, 0.0  ;;  %v652_v52 = vmul.f32 0.01, %v642_v50 }
 0x36c   :  { %v653_v56 = vsel %vm645_vm13, %v569_v45, %v649_v47  ;;  %v655_v57 = vsel %vm647_vm14, %v640_v46, %v651_v48 }
 0x36d   :  { %v654_v53 = vsel %vm646_vm15, %v571_v49, %v650_v51  ;;  %v656_v54 = vsel %vm648_vm1, %v642_v50, %v652_v52 }
 0x36e   :  { %662 = vmatprep.subr.mxu0 %v654_v53  ;;  %733 = vmatprep.subr.mxu1 %v656_v54 }
 0x36f   :  { %663 = vmatpush1.msra.mxu0 %v653_v56  ;;  %734 = vmatpush1.msra.mxu1 %v655_v57 }
 0x370   :  { %991 = vmatmul.mubr.msk.f32.vlgmr.msra.gmra.mrb[8].mxu0 %vm18_vm0, %v990_v55  ;;  %992 = vmatmul.mubr.msk.f32.vlgmr.msra.gmra.mrb[8].mxu1 %vm18_vm0, %v990_v55 }
 0x371   :  { %885 = vmatprep.mubr.f32.mxu0 %v1005_v3  ;;  %956 = vmatprep.mubr.f32.mxu1 %v1005_v3 }
 0x443   :  { %v728_v58 = vpop.f32.mrb[8].mxu0  ;;  %v799_v59 = vpop.f32.mrb[8].mxu1 }
 0x444   :  { %v808_v60 = vmul.f32 0.01, %v728_v58  ;;  %vm804_vm2 = vcmp.gt.f32.partialorder %v728_v58, 0.0  ;;  %vm806_vm3 = vcmp.gt.f32.partialorder %v799_v59, 0.0  ;;  %v810_v61 = vmul.f32 0.01, %v799_v59 }
 0x445   :  { %v730_v62 = vpop.f32.mrb[9].mxu0  ;;  %v801_v63 = vpop.f32.mrb[9].mxu1 }
 0x446   :  { %vm805_vm4 = vcmp.gt.f32.partialorder %v730_v62, 0.0  ;;  %v809_v0 = vmul.f32 0.01, %v730_v62  ;;  %vm807_vm5 = vcmp.gt.f32.partialorder %v801_v63, 0.0  ;;  %v811_v1 = vmul.f32 0.01, %v801_v63 }
 0x447   :  { %v812_v3 = vsel %vm804_vm2, %v728_v58, %v808_v60  ;;  %v814_v6 = vsel %vm806_vm3, %v799_v59, %v810_v61 }
 0x448   :  { %v813_v2 = vsel %vm805_vm4, %v730_v62, %v809_v0  ;;  %v815_v4 = vsel %vm807_vm5, %v801_v63, %v811_v1 }
 0x449   :  { %821 = vmatprep.subr.mxu0 %v813_v2  ;;  %892 = vmatprep.subr.mxu1 %v815_v4 }
 0x44a   :  { %822 = vmatpush1.msra.mxu0 %v812_v3  ;;  %893 = vmatpush1.msra.mxu1 %v814_v6 }
 0x44b   :  { %994 = vmatmul.mubr.msk.f32.vlgmr.msra.gmra.mrb[10].mxu0 %vm18_vm0, %v993_v5  ;;  %995 = vmatmul.mubr.msk.f32.vlgmr.msra.gmra.mrb[10].mxu1 %vm18_vm0, %v993_v5 }
 0x51e   :  { %v887_v7 = vpop.f32.mrb[10].mxu0  ;;  %v958_v8 = vpop.f32.mrb[10].mxu1 }
 0x51f   :  { %997 = vtanh.f32 %v887_v7  ;;  %v889_v9 = vpop.f32.mrb[11].mxu0  ;;  %v960_v10 = vpop.f32.mrb[11].mxu1 }
 0x520   :  { %999 = vtanh.f32 %v958_v8 }
 0x521   :  { %1001 = vtanh.f32 %v889_v9 }
 0x522   :  { %1003 = vtanh.f32 %v960_v10 }
 0x529   :  { %v998_v11 = vpop.eup %997 }
 0x52a   :  { %v1000_v12 = vpop.eup %999  ;;  %967 = vst [vmem:[%s1107_s3] sm:$0xff] %v998_v11 }
 0x52b   :  { %v1002_v13 = vpop.eup %1001  ;;  %969 = vst [vmem:[%s1107_s3 + $0x10] sm:$0xff] %v1000_v12 }
 0x52c   :  { %v1004_v14 = vpop.eup %1003  ;;  %968 = vst [vmem:[%s1107_s3 + $0x8] sm:$0xff] %v1002_v13 }
 0x52d   :  { %970 = vst [vmem:[%s1107_s3 + $0x18] sm:$0xff] %v1004_v14 }

</bundles_post_ra>
